<compile_context>
chip_gen: v5e
topology: v5e:2x2
jax: 0.10.0
libtpu: 0.0.40
codegen_flags: <defaults>
</compile_context>

<pallas_src>
import jax
import jax.numpy as jnp
from jax.experimental import pallas as pl
from jax.experimental.pallas import tpu as pltpu

BN_EPS = 1e-5
LEAKY_SLOPE = 0.2
_TN_CAP = 1024
_TK_CAP = 2048


def setop_block_kernel(x_ref, res_ref, w_ref, bgb_ref, wg_ref, bg_ref,
                       out_ref, acc_ref):
    k = pl.program_id(1)
    tk = w_ref.shape[0]

    @pl.when(k == 0)
    def _init():
        acc_ref[...] = jnp.zeros_like(acc_ref)

    # Current K chunk of the resident x block (lane-aligned dynamic slice).
    k0 = pl.multiple_of(k * tk, 128)
    xk = x_ref[:, pl.ds(k0, tk)]                           # [B, tk] f32

    # fc partial product: x[B,tk] . W[tk,tn]  (weight pre-transposed to [K,N],
    # streamed in w_ref.dtype -- bf16 by default -- with f32 accumulation).
    acc_ref[...] += jax.lax.dot_general(
        xk.astype(w_ref.dtype), w_ref[...],
        (((1,), (0,)), ((), ())),
        preferred_element_type=jnp.float32)

    @pl.when(k == pl.num_programs(1) - 1)
    def _epilogue():
        bgb = bgb_ref[...]                                 # [3, tn]: fc_b, gamma, beta
        h = acc_ref[...] + bgb[0:1, :]                     # Linear output

        # BatchNorm1d (training-mode batch stats, biased var), folded affine.
        mean = jnp.mean(h, axis=0, keepdims=True)          # [1, tn]
        var = jnp.mean((h - mean) * (h - mean), axis=0, keepdims=True)
        scale = bgb[1:2, :] * jax.lax.rsqrt(var + BN_EPS)
        shift = bgb[2:3, :] - mean * scale

        # Gate projection from the resident x / gate weight (VPU/XLU filler
        # under the DMA bound; computed once per N tile, f32 throughout).
        logit = jnp.sum(x_ref[...] * wg_ref[...], axis=1, keepdims=True)
        g = jax.nn.sigmoid(logit + bg_ref[0])              # [B, 1]

        y = h * scale + shift + g * res_ref[...]
        out_ref[...] = jnp.maximum(y, LEAKY_SLOPE * y).astype(out_ref.dtype)


def _round_up(n, m):
    return -(-n // m) * m


def _pick_tile(dp, cap):
    cap = max(128, min(cap, dp))
    cap -= cap % 128
    for c in range(cap, 127, -128):
        if dp % c == 0:
            return c
    return 128


def prepare_params(params, *, weight_dtype=jnp.bfloat16):
    """One-time parameter prep: pad to lane multiples, cast, pre-transpose."""
    D = params["fc_w"].shape[0]
    Dp = max(128, _round_up(D, 128))
    pad = Dp - D

    w_t = params["fc_w"].astype(jnp.float32).T                 # [K, N]
    if pad:
        w_t = jnp.pad(w_t, ((0, pad), (0, pad)))                # single pad, both axes
    w_t = w_t.astype(weight_dtype)

    bgb = jnp.stack([params["fc_b"], params["bn_gamma"],
                     params["bn_beta"]]).astype(jnp.float32)    # [3, D]
    wg = params["gate_w"].astype(jnp.float32).reshape(1, D)     # [1, D]
    if pad:
        bgb = jnp.pad(bgb, ((0, 0), (0, pad)))
        wg = jnp.pad(wg, ((0, 0), (0, pad)))
    bg = params["gate_b"].astype(jnp.float32).reshape(1)        # SMEM scalar

    return {"w_t": w_t, "bgb": bgb, "wg": wg, "bg": bg,
            "dim": D, "padded_dim": Dp}


def setop_res_basic_block_v1(x, residual, prep, *, tn=None, tk=None):
    """out = LeakyReLU(BatchNorm(fc(x)) + sigmoid(gate(x)) * residual)."""
    B, D = x.shape
    assert D == prep["dim"], (D, prep["dim"])
    Dp = prep["padded_dim"]
    pad = Dp - D

    def pad_cols(a):
        return jnp.pad(a, ((0, 0), (0, pad))) if pad else a

    xp = pad_cols(x.astype(jnp.float32))
    rp = pad_cols(residual.astype(jnp.float32))
    w_t, bgb, wg, bg = prep["w_t"], prep["bgb"], prep["wg"], prep["bg"]

    # >= 2 N tiles whenever possible so the parallel axis shards across both
    # v7x TensorCores; big K tiles for long contiguous weight-DMA rows.
    if tn is None:
        tn = _pick_tile(Dp, min(_TN_CAP, Dp // 2 if Dp >= 256 else Dp))
    if tk is None:
        tk = _pick_tile(Dp, _TK_CAP)
    assert Dp % tn == 0 and Dp % tk == 0 and tn % 128 == 0 and tk % 128 == 0

    grid = (Dp // tn, Dp // tk)          # (N tiles: parallel, K tiles: reduction)

    # VMEM: double-buffered weight tiles dominate; residents counted twice to
    # stay conservative.  1.5x headroom, clamped to <= 32 MiB (v7x-safe).
    wbytes = jnp.dtype(w_t.dtype).itemsize
    est = (2 * tn * tk * wbytes          # weight tiles
           + 2 * B * Dp * 4              # resident x
           + 2 * Dp * 4                  # resident gate weight
           + 2 * B * tn * 4              # residual tiles
           + 2 * B * tn * 4              # output tiles
           + 2 * 3 * tn * 4              # fc_b / gamma / beta tiles
           + B * tn * 4)                 # f32 accumulator
    vmem_limit = int(min(max(int(est * 1.5), 16 << 20), 32 << 20))

    grid_spec = pltpu.PrefetchScalarGridSpec(
        num_scalar_prefetch=0,
        grid=grid,
        in_specs=[
            pl.BlockSpec((B, Dp), lambda j, k: (0, 0)),          # x (resident)
            pl.BlockSpec((B, tn), lambda j, k: (0, j)),          # residual
            pl.BlockSpec((tk, tn), lambda j, k: (k, j)),         # fc weight [K, N]
            pl.BlockSpec((3, tn), lambda j, k: (0, j)),          # fc_b / gamma / beta
            pl.BlockSpec((1, Dp), lambda j, k: (0, 0)),          # gate weight (resident)
            pl.BlockSpec(memory_space=pltpu.MemorySpace.SMEM),   # gate bias scalar
        ],
        out_specs=pl.BlockSpec((B, tn), lambda j, k: (0, j)),
        scratch_shapes=[
            pltpu.VMEM((B, tn), jnp.float32),                    # fc accumulator
        ],
    )

    out = pl.pallas_call(
        setop_block_kernel,
        out_shape=jax.ShapeDtypeStruct((B, Dp), jnp.float32),
        grid_spec=grid_spec,
        compiler_params=pltpu.CompilerParams(
            dimension_semantics=("parallel", "arbitrary"),
            vmem_limit_bytes=vmem_limit),
    )(xp, rp, w_t, bgb, wg, bg)

    return out[:, :D] if pad else out


def reference(x, residual, params, *, weight_dtype=jnp.float32):
    """Pure-JAX reference; weight_dtype mimics the kernel's streamed dtype."""
    xw = x.astype(weight_dtype).astype(jnp.float32)
    w = params["fc_w"].astype(weight_dtype).astype(jnp.float32)
    h = xw @ w.T + params["fc_b"]
    mean = jnp.mean(h, axis=0, keepdims=True)
    var = jnp.mean((h - mean) ** 2, axis=0, keepdims=True)
    bn = (h - mean) / jnp.sqrt(var + BN_EPS) * params["bn_gamma"] + params["bn_beta"]
    logit = jnp.sum(x * params["gate_w"], axis=1, keepdims=True) + params["gate_b"]
    g = jax.nn.sigmoid(logit)
    y = bn + g * residual
    return jnp.where(y >= 0, y, LEAKY_SLOPE * y)


def init_params(key, latent_dim):
    k1, k2, k3, k4 = jax.random.split(key, 4)
    bound_fc = 1.0 / jnp.sqrt(latent_dim)
    return {
        "fc_w": jax.random.uniform(k1, (latent_dim, latent_dim),
                                   minval=-bound_fc, maxval=bound_fc,
                                   dtype=jnp.float32),
        "fc_b": jax.random.uniform(k2, (latent_dim,),
                                   minval=-bound_fc, maxval=bound_fc,
                                   dtype=jnp.float32),
        "bn_gamma": jnp.ones((latent_dim,), jnp.float32),
        "bn_beta": jnp.zeros((latent_dim,), jnp.float32),
        "gate_w": jax.random.uniform(k3, (latent_dim,),
                                     minval=-bound_fc, maxval=bound_fc,
                                     dtype=jnp.float32),
        "gate_b": jax.random.uniform(k4, (1,),
                                     minval=-bound_fc, maxval=bound_fc,
                                     dtype=jnp.float32),
    }


if __name__ == "__main__":
    key = jax.random.PRNGKey(0)
    cases = [
        # (B, D): first exercises a (2, 1) grid (two parallel N tiles, tk=256);
        # second exercises D padding (96 -> 128) and a batch that is not a
        # sublane multiple (full-dim sublane block).
        (8, 256),
        (6, 96),
    ]
    for (B, D) in cases:
        key, kx, kr, kp = jax.random.split(key, 4)
        x = jax.random.normal(kx, (B, D), dtype=jnp.float32)
        residual = jax.random.normal(kr, (B, D), dtype=jnp.float32)
        params = init_params(kp, D)

        # Default fast path: bf16 weight streaming, f32 accumulation.
        prep_bf16 = prepare_params(params, weight_dtype=jnp.bfloat16)
        out_bf16 = jax.block_until_ready(
            setop_res_basic_block_v1(x, residual, prep_bf16))
        ref_bf16 = reference(x, residual, params, weight_dtype=jnp.bfloat16)
        assert out_bf16.shape == (B, D)
        err = float(jnp.max(jnp.abs(out_bf16 - ref_bf16)))
        assert jnp.allclose(out_bf16, ref_bf16, atol=5e-3, rtol=5e-3), (
            f"bf16 path B={B} D={D}: max abs err {err}")

        # Full-precision path (matches the f32 reference tightly).
        prep_f32 = prepare_params(params, weight_dtype=jnp.float32)
        out_f32 = jax.block_until_ready(
            setop_res_basic_block_v1(x, residual, prep_f32))
        ref_f32 = reference(x, residual, params, weight_dtype=jnp.float32)
        err = float(jnp.max(jnp.abs(out_f32 - ref_f32)))
        assert jnp.allclose(out_f32, ref_f32, atol=1e-4, rtol=1e-4), (
            f"f32 path B={B} D={D}: max abs err {err}")

    print("KERNEL_OK")
</pallas_src>

<mosaic_0001>
module attributes {stable_mosaic.version = 11 : i64} {
  func.func @setop_block_kernel(%arg0: i32, %arg1: i32, %arg2: memref<8x256xf32, #tpu.memory_space<vmem>>, %arg3: memref<8x128xf32, #tpu.memory_space<vmem>>, %arg4: memref<256x128xbf16, #tpu.memory_space<vmem>>, %arg5: memref<3x128xf32, #tpu.memory_space<vmem>>, %arg6: memref<1x256xf32, #tpu.memory_space<vmem>>, %arg7: memref<1xf32, #tpu.memory_space<smem>>, %arg8: memref<8x128xf32, #tpu.memory_space<vmem>>, %arg9: memref<8x128xf32, #tpu.memory_space<vmem>>) attributes {dimension_semantics = [#tpu.dimension_semantics<parallel>, #tpu.dimension_semantics<arbitrary>], iteration_bounds = array<i64: 2, 1>, scalar_prefetch = 0 : i64, scratch_operands = 1 : i64, tpu.core_type = #tpu.core_type<tc>, window_params = [{pipeline_mode = #tpu.pipeline_mode<synchronous>, transform_indices = @transform_0, window_bounds = array<i64: 8, 256>}, {transform_indices = @transform_1, window_bounds = array<i64: 8, 128>}, {transform_indices = @transform_2, window_bounds = array<i64: 256, 128>}, {transform_indices = @transform_3, window_bounds = array<i64: 3, 128>}, {pipeline_mode = #tpu.pipeline_mode<synchronous>, transform_indices = @transform_4, window_bounds = array<i64: 1, 256>}, {transform_indices = @transform_5, window_bounds = array<i64: 1>}, {transform_indices = @transform_6, window_bounds = array<i64: 8, 128>}]} {
    %c0_i32 = arith.constant 0 : i32
    %0 = arith.cmpi eq, %arg1, %c0_i32 : i32
    %1 = arith.extui %0 : i1 to i32
    %c0_i32_0 = arith.constant 0 : i32
    %2 = arith.cmpi ne, %1, %c0_i32_0 : i32
    scf.if %2 {
      %cst_9 = arith.constant 0.000000e+00 : f32
      %16 = vector.broadcast %cst_9 : f32 to vector<8x128xf32>
      %c0_10 = arith.constant 0 : index
      %c0_11 = arith.constant 0 : index
      %17 = vector.load %arg9[%c0_10, %c0_11] : memref<8x128xf32, #tpu.memory_space<vmem>>, vector<8x128xf32>
      tpu.vector_store %arg9[%c0_10, %c0_11], %16 {strides = array<i32>} : memref<8x128xf32, #tpu.memory_space<vmem>>, vector<8x128xf32>,
    } else {
    }
    %c256_i32 = arith.constant 256 : i32
    %3 = arith.muli %arg1, %c256_i32 : i32
    %4 = tpu.assume_multiple %3, 128 : i32
    %c0 = arith.constant 0 : index
    %5 = arith.index_cast %4 : i32 to index
    %6 = vector.load %arg2[%c0, %5] : memref<8x256xf32, #tpu.memory_space<vmem>>, vector<8x256xf32>
    %c0_1 = arith.constant 0 : index
    %c0_2 = arith.constant 0 : index
    %7 = vector.load %arg9[%c0_1, %c0_2] : memref<8x128xf32, #tpu.memory_space<vmem>>, vector<8x128xf32>
    %8 = arith.truncf %6 : vector<8x256xf32> to vector<8x256xbf16>
    %c0_3 = arith.constant 0 : index
    %c0_4 = arith.constant 0 : index
    %9 = vector.load %arg4[%c0_3, %c0_4] : memref<256x128xbf16, #tpu.memory_space<vmem>>, vector<256x128xbf16>
    %cst = arith.constant dense<0.000000e+00> : vector<8x128xf32>
    %10 = tpu.matmul %8, %9, %cst {dimension_numbers = #tpu.dot_dimension_numbers<[1], [0], [0], [1], [0, 0, 1, 1], [], []>} : vector<8x256xbf16>, vector<256x128xbf16>, vector<8x128xf32> -> vector<8x128xf32>
    %11 = arith.addf %7, %10 : vector<8x128xf32>
    %c0_5 = arith.constant 0 : index
    %c0_6 = arith.constant 0 : index
    %12 = vector.load %arg9[%c0_5, %c0_6] : memref<8x128xf32, #tpu.memory_space<vmem>>, vector<8x128xf32>
    tpu.vector_store %arg9[%c0_5, %c0_6], %11 {strides = array<i32>} : memref<8x128xf32, #tpu.memory_space<vmem>>, vector<8x128xf32>,
    %c0_i32_7 = arith.constant 0 : i32
    %13 = arith.cmpi eq, %arg1, %c0_i32_7 : i32
    %14 = arith.extui %13 : i1 to i32
    %c0_i32_8 = arith.constant 0 : i32
    %15 = arith.cmpi ne, %14, %c0_i32_8 : i32
    scf.if %15 {
      %c0_9 = arith.constant 0 : index
      %c0_10 = arith.constant 0 : index
      %16 = vector.load %arg5[%c0_9, %c0_10] : memref<3x128xf32, #tpu.memory_space<vmem>>, vector<3x128xf32>
      %c0_11 = arith.constant 0 : index
      %c0_12 = arith.constant 0 : index
      %17 = vector.load %arg9[%c0_11, %c0_12] : memref<8x128xf32, #tpu.memory_space<vmem>>, vector<8x128xf32>
      %18 = vector.extract_strided_slice %16 {offsets = [0, 0], sizes = [1, 128], strides = [1, 1]} : vector<3x128xf32> to vector<1x128xf32>
      %19 = vector.broadcast %18 : vector<1x128xf32> to vector<8x128xf32>
      %20 = arith.addf %17, %19 : vector<8x128xf32>
      %cst_13 = arith.constant dense<0.000000e+00> : vector<128xf32>
      %21 = vector.multi_reduction <add>, %20, %cst_13 [0] : vector<8x128xf32> to vector<128xf32>
      %22 = vector.shape_cast %21 : vector<128xf32> to vector<1x128xf32>
      %cst_14 = arith.constant 8.000000e+00 : f32
      %23 = vector.broadcast %cst_14 : f32 to vector<1x128xf32>
      %24 = arith.divf %22, %23 : vector<1x128xf32>
      %25 = vector.broadcast %24 : vector<1x128xf32> to vector<8x128xf32>
      %26 = arith.subf %20, %25 : vector<8x128xf32>
      %27 = vector.broadcast %24 : vector<1x128xf32> to vector<8x128xf32>
      %28 = arith.subf %20, %27 : vector<8x128xf32>
      %29 = arith.mulf %26, %28 : vector<8x128xf32>
      %cst_15 = arith.constant dense<0.000000e+00> : vector<128xf32>
      %30 = vector.multi_reduction <add>, %29, %cst_15 [0] : vector<8x128xf32> to vector<128xf32>
      %31 = vector.shape_cast %30 : vector<128xf32> to vector<1x128xf32>
      %cst_16 = arith.constant 8.000000e+00 : f32
      %32 = vector.broadcast %cst_16 : f32 to vector<1x128xf32>
      %33 = arith.divf %31, %32 : vector<1x128xf32>
      %34 = vector.extract_strided_slice %16 {offsets = [1, 0], sizes = [1, 128], strides = [1, 1]} : vector<3x128xf32> to vector<1x128xf32>
      %cst_17 = arith.constant 9.99999974E-6 : f32
      %35 = vector.broadcast %cst_17 : f32 to vector<1x128xf32>
      %36 = arith.addf %33, %35 : vector<1x128xf32>
      %37 = math.rsqrt %36 : vector<1x128xf32>
      %38 = arith.mulf %34, %37 : vector<1x128xf32>
      %39 = vector.extract_strided_slice %16 {offsets = [2, 0], sizes = [1, 128], strides = [1, 1]} : vector<3x128xf32> to vector<1x128xf32>
      %40 = arith.mulf %24, %38 : vector<1x128xf32>
      %41 = arith.subf %39, %40 : vector<1x128xf32>
      %c0_18 = arith.constant 0 : index
      %c0_19 = arith.constant 0 : index
      %42 = vector.load %arg2[%c0_18, %c0_19] : memref<8x256xf32, #tpu.memory_space<vmem>>, vector<8x256xf32>
      %c0_20 = arith.constant 0 : index
      %c0_21 = arith.constant 0 : index
      %43 = vector.load %arg6[%c0_20, %c0_21] : memref<1x256xf32, #tpu.memory_space<vmem>>, vector<1x256xf32>
      %44 = vector.broadcast %43 : vector<1x256xf32> to vector<8x256xf32>
      %45 = arith.mulf %42, %44 : vector<8x256xf32>
      %cst_22 = arith.constant dense<0.000000e+00> : vector<8xf32>
      %46 = vector.multi_reduction <add>, %45, %cst_22 [1] : vector<8x256xf32> to vector<8xf32>
      %47 = vector.shape_cast %46 : vector<8xf32> to vector<8x1xf32>
      %c0_23 = arith.constant 0 : index
      %48 = memref.load %arg7[%c0_23] : memref<1xf32, #tpu.memory_space<smem>>
      %49 = vector.broadcast %48 : f32 to vector<8x1xf32>
      %50 = arith.addf %47, %49 : vector<8x1xf32>
      %51 = arith.negf %50 : vector<8x1xf32>
      %52 = math.exp %51 : vector<8x1xf32>
      %cst_24 = arith.constant 1.000000e+00 : f32
      %53 = vector.broadcast %cst_24 : f32 to vector<8x1xf32>
      %54 = arith.addf %53, %52 : vector<8x1xf32>
      %55 = arith.divf %53, %54 : vector<8x1xf32>
      %56 = vector.broadcast %38 : vector<1x128xf32> to vector<8x128xf32>
      %57 = arith.mulf %20, %56 : vector<8x128xf32>
      %58 = vector.broadcast %41 : vector<1x128xf32> to vector<8x128xf32>
      %59 = arith.addf %57, %58 : vector<8x128xf32>
      %c0_25 = arith.constant 0 : index
      %c0_26 = arith.constant 0 : index
      %60 = vector.load %arg3[%c0_25, %c0_26] : memref<8x128xf32, #tpu.memory_space<vmem>>, vector<8x128xf32>
      %61 = vector.broadcast %55 : vector<8x1xf32> to vector<8x128xf32>
      %62 = arith.mulf %61, %60 : vector<8x128xf32>
      %63 = arith.addf %59, %62 : vector<8x128xf32>
      %cst_27 = arith.constant 2.000000e-01 : f32
      %64 = vector.broadcast %cst_27 : f32 to vector<8x128xf32>
      %65 = arith.mulf %64, %63 : vector<8x128xf32>
      %66 = arith.maximumf %63, %65 : vector<8x128xf32>
      %c0_28 = arith.constant 0 : index
      %c0_29 = arith.constant 0 : index
      %67 = vector.load %arg8[%c0_28, %c0_29] : memref<8x128xf32, #tpu.memory_space<vmem>>, vector<8x128xf32>
      tpu.vector_store %arg8[%c0_28, %c0_29], %66 {strides = array<i32>} : memref<8x128xf32, #tpu.memory_space<vmem>>, vector<8x128xf32>,
    } else {
    }
    return
  }
  func.func @transform_0(%arg0: i32, %arg1: i32) -> (i32, i32) {
    %c0_i32 = arith.constant 0 : i32
    %c0_i32_0 = arith.constant 0 : i32
    %c0_i32_1 = arith.constant 0 : i32
    return %c0_i32, %c0_i32_0 : i32, i32
  }
  func.func @transform_1(%arg0: i32, %arg1: i32) -> (i32, i32) {
    %c0_i32 = arith.constant 0 : i32
    %c0_i32_0 = arith.constant 0 : i32
    return %c0_i32, %arg0 : i32, i32
  }
  func.func @transform_2(%arg0: i32, %arg1: i32) -> (i32, i32) {
    %c0_i32 = arith.constant 0 : i32
    return %arg1, %arg0 : i32, i32
  }
  func.func @transform_3(%arg0: i32, %arg1: i32) -> (i32, i32) {
    %c0_i32 = arith.constant 0 : i32
    %c0_i32_0 = arith.constant 0 : i32
    return %c0_i32, %arg0 : i32, i32
  }
  func.func @transform_4(%arg0: i32, %arg1: i32) -> (i32, i32) {
    %c0_i32 = arith.constant 0 : i32
    %c0_i32_0 = arith.constant 0 : i32
    %c0_i32_1 = arith.constant 0 : i32
    return %c0_i32, %c0_i32_0 : i32, i32
  }
  func.func @transform_5(%arg0: i32, %arg1: i32) -> i32 {
    %c0_i32 = arith.constant 0 : i32
    %c0_i32_0 = arith.constant 0 : i32
    return %c0_i32 : i32
  }
  func.func @transform_6(%arg0: i32, %arg1: i32) -> (i32, i32) {
    %c0_i32 = arith.constant 0 : i32
    %c0_i32_0 = arith.constant 0 : i32
    return %c0_i32, %arg0 : i32, i32
  }
}

</mosaic_0001>

<bundles_post_ra>
// kernel: tpu_custom_call.1
= control target key start
LH: loop header
LB: loop body
LE: loop exit
PB: predicated region body
PF: predicated region fallthrough
CT: control target
= control target key end

     0   :  { %s1480_s0 = inlined_call_operand.hbm [shape: f32[8,256], index: 0, kind: input, shape index: {}]   ;;  %s1481_s1 = inlined_call_operand.hbm [shape: f32[8,256], index: 1, kind: input, shape index: {}]   ;;  %s1482_s2 = inlined_call_operand.hbm [shape: bf16[256,256], index: 2, kind: input, shape index: {}]   ;;  %s1483_s3 = inlined_call_operand.hbm [shape: f32[3,256], index: 3, kind: input, shape index: {}]   ;;  %s1484_s4 = inlined_call_operand.vmem [shape: f32[1,256], index: 4, kind: input, shape index: {}]   ;;  %s1485_s5 = inlined_call_operand.<no memory space> [shape: f32[1], index: 5, kind: input, shape index: {}]   ;;  %s1486_s6 = inlined_call_operand.hbm [shape: f32[8,256], index: 6, kind: output, shape index: {}]  }
   0x1   :  { %1492 = sst [smem:[#allocation21_spill]] %s1480_s0 }
   0x2   :  { %1493 = sst [smem:[#allocation22_spill]] %s1481_s1 }
   0x3   :  { %1494 = sst [smem:[#allocation23_spill]] %s1482_s2 }
   0x4   :  { %11 = sst [smem:[#allocation3]] %s1485_s5 }
   0x5   :  { %12 = vsyncpa [#allocation5], 0 }
   0x6   :  { %13 = vsyncpa [#allocation8], 0 }
   0x7   :  { %15 = vsyncpa [#allocation8 + $0x1], 0 }
   0x8   :  { %16 = vsyncpa [#allocation11], 0 }
   0x9   :  { %18 = vsyncpa [#allocation11 + $0x1], 0 }
   0xa   :  { %19 = vsyncpa [#allocation6], 0 }
   0xb   :  { %21 = vsyncpa [#allocation6 + $0x1], 0  ;;  %s1248_s23 = smov 0   ;;  %s1250_s24 = smov 0  }
   0xc   :  { %s1252_s25 = smov 0   ;;  %s1254_s26 = smov 0  }
   0xd   :  { %s1256_s27 = smov 0   ;;  %s1258_s28 = smov 0  }
   0xe LB: > { %1495 = sst [smem:[#allocation17_spill]] %s1191_s25  ;;  %s39_s5 = sadd.s32 1, %s1199_s27  ;;  %s1203_s28 = sphi %s1258_s28, %s27_s28   ;;  %s1199_s27 = sphi %s1256_s27, %s1516_s27   ;;  %s1195_s26 = sphi %s1254_s26, %s1515_s26   ;;  %s1191_s25 = sphi %s1252_s25, %s1511_s25   ;;  %s1187_s24 = sphi %s1250_s24, %s1514_s24   ;;  %s1183_s23 = sphi %s1248_s23, %s1513_s23  }
   0xf   : > { %1496 = sst [smem:[#allocation18_spill]] %s1203_s28  ;;  %s67_s29 = sadd.s32 1, %s1191_s25 }
  0x10   : > { %p41_p0 = scmp.ge.s32.totalorder %s39_s5, 2  ;;  %p74_p1 = scmp.ne.s32.totalorder %s1191_s25, %s1187_s24 }
  0x11   : > { %p75_p2 = scmp.eq.s32.totalorder %s1203_s28, 0  ;;  %p800_p3 = scmp.ge.s32.totalorder %s1203_s28, 2 }
  0x12   : > { %s1518_s5 = smov (%p41_p0, %s39_s5), 0  ;;  %p929_p5 = scmp.lt.s32.totalorder %s1203_s28, 2 }
  0x13   : > { %1497 = sst [smem:[#allocation19_spill]] %s1518_s5  ;;  %p1289_p4 = por %p75_p2, %p74_p1 }
  0x14   : > { %s64_s7 = ssub.s32 %s1199_s27, %s1518_s5  ;;  %s244_s8 = sand.u32 1, %s1203_s28  }
  0x15   : > { %p65_p6 = scmp.eq.s32.totalorder %s64_s7, 0  ;;  %s1298_s9 = sand.u32 1, %s1191_s25  }
  0x16   : > { %s802_s10 = sshll.u32 %s1199_s27, 3  ;;  %s801_s12 = sshll.u32 %s1298_s9, 3 }
  0x17   : > { %s1302_s11 = scalar_select %p65_p6, %s1191_s25, %s67_s29  }
  0x18   : > { %s1500_s1 = sld [smem:[#allocation22_spill]]  ;;  %s248_s17 = scalar_lea.vmem [#allocation7], %s801_s12 }
  0x19   : > { %1499 = sst [smem:[#allocation20_spill]] %s1302_s11  ;;  %s256_s18 = sshll.u32 %s248_s17, 4  ;;  %s257_s18 = int_to_ptr.vmem [resolvable:$true] %s256_s18 }
  0x1a   : > { %p1312_p7 = pnand %p929_p5, %p1289_p4  ;;  %s803_s20 = sshll.u32 %s1298_s9, 7 }
  0x1b   : > { %s1487_s21 = sshll.u32 %s1199_s27, 2  ;;  %s1318_s22 = scalar_lea.sflag [#allocation8], %s244_s8 }
  0x1c   : > { %s1502_s2 = sld [smem:[#allocation23_spill]]  ;;  %s1329_s14 = sadd.s32 4294967295, %s1203_s28  }
  0x1d   : > { %s797_s8 = sadd.s32 4294967294, %s1203_s28   ;;  %p80_p8 = scmp.ne.s32.totalorder %s1187_s24, %s1183_s23 }
  0x1e   : > { %s252_s15 = scalar_lea.hbm %s1500_s1, %s802_s10  ;;  %s267_s10 = scalar_lea.vmem [#allocation9], %s803_s20 }
  0x1f   : > { %s254_s16 = sshll.u32 %s252_s15, 4  ;;  %s277_s12 = sshll.u32 %s267_s10, 4  ;;  %s255_s16 = int_to_ptr.hbm [resolvable:$true] %s254_s16  ;;  %s278_s12 = int_to_ptr.vmem [resolvable:$true] %s277_s12 }
  0x20   : > { %917 = dma.hbm_to_vmem [thread:$0]  (!%p1312_p7), %s255_s16, 128, %s257_s18, %s1318_s22  }
  0x21   : > { %p81_p9 = scmp.eq.s32.totalorder %s1329_s14, 0  ;;  %p200_p10 = scmp.eq.s32.totalorder %s1329_s14, 1 }
  0x22   : > { %s274_s30 = scalar_lea.hbm %s1502_s2, %s1487_s21  ;;  %p206_p11 = scmp.eq.s32.totalorder %s797_s8, 1 }
  0x23   : > { %s275_s13 = sshll.u32 %s274_s30, 4  ;;  %p798_p12 = scmp.ge.s32.totalorder %s1203_s28, 1  ;;  %s276_s13 = int_to_ptr.hbm [resolvable:$true] %s275_s13 }
  0x24   : > { %p1339_p13 = por %p81_p9, %p80_p8  ;;  %p1346_p0 = por %p200_p10, %p74_p1 }
  0x25   : > { %p1350_p2 = por %p206_p11, %p80_p8  ;;  %p213_p4 = scmp.lt.s32.totalorder %s1203_s28, 3 }
  0x26   : > { %s1506_s0 = sld [smem:[#allocation21_spill]]  ;;  %s1205_s30 = smov [#allocation4]  }
  0x27   : > { %p1358_p5 = pnand %p798_p12, %p213_p4  ;;  %s227_s10 = sshll.u32 %s1205_s30, 4  ;;  %s228_s10 = int_to_ptr.vmem [resolvable:$true] %s227_s10 }
  0x28   : > { %s1206_s8 = smov 128   ;;  %s1207_s21 = smov 64  }
  0x29   : > { %p910_p1 = pneg %p1358_p5  ;;  %s1208_s1 = smov 4  }
  0x2a   : > { %920 = dma.hbm_to_vmem [thread:$0]  (!%p1312_p7), %s276_s13, 2048, %s278_s12, %s1318_s22, %s1206_s8, %s1207_s21, %s1208_s1  }
  0x2b   : > { %p911_p6 = pnand %p910_p1, %p81_p9  ;;  %s805_s18 = sshll.u32 %s1298_s9, 2 }
  0x2c   : > { %s225_s29 = sshll.u32 %s1506_s0, 4  ;;  %s1508_s20 = sshll.u32 %s1199_s27, 2  ;;  %s226_s29 = int_to_ptr.hbm [resolvable:$true] %s225_s29 }
  0x2d   : > { %913 = dma.hbm_to_vmem [thread:$0]  (!%p911_p6), %s226_s29, 256, %s228_s10, [#allocation5]  }
  0x2e   : > { %s295_s5 = scalar_lea.hbm %s1483_s3, %s1508_s20  ;;  %s291_s25 = scalar_lea.vmem [#allocation10], %s805_s18 }
  0x2f   : > { %s297_s11 = sshll.u32 %s295_s5, 4  ;;  %s299_s30 = sshll.u32 %s291_s25, 4  ;;  %s298_s11 = int_to_ptr.hbm [resolvable:$true] %s297_s11  ;;  %s300_s30 = int_to_ptr.vmem [resolvable:$true] %s299_s30 }
  0x30   : > { %s288_s28 = scalar_lea.sflag [#allocation11], %s1298_s9  ;;  %308 = sbr.rel (%p1358_p5) target bundleno = 298 (0x12a), region = 44 }
  0x31   : > { %923 = dma.hbm_to_vmem [thread:$0]  (!%p1312_p7), %s298_s11, 64, %s300_s30, %s288_s28  }
  0x35   : > { %1166 = dma.done.wait (%p81_p9), [#allocation5], 256  }
  0x36   : > { %1168 = vsyncadd (%p81_p9), [#allocation5], 4294967040  ;;  %s315_s0 = sand.u32 1, %s1329_s14   ;;  %s1386_s1 = sand.u32 1, %s1187_s24  }
  0x37   : > { %s809_s2 = sshll.u32 %s1386_s1, 3  ;;  %s316_s25 = scalar_lea.sflag [#allocation8], %s315_s0 }
  0x38   : > { %s1391_s28 = scalar_lea.vmem [#allocation7], %s809_s2 }
  0x39   : > { %1170 = dma.done.wait (%p1339_p13), %s316_s25, 2176  }
  0x3a   : > { %1172 = vsyncadd (%p1339_p13), %s316_s25, 4294965120  ;;  %s810_s5 = sshll.u32 %s1386_s1, 7  ;;  %s811_s9 = sshll.u32 %s1386_s1, 2 }
  0x3b   : > { %s1399_s11 = scalar_lea.vmem [#allocation9], %s810_s5  ;;  %s336_s19 = scalar_lea.sflag [#allocation11], %s1386_s1 }
  0x3c   : > { %s1402_s21 = scalar_lea.vmem [#allocation10], %s811_s9 }
  0x3d   : > { %1174 = dma.done.wait (%p1339_p13), %s336_s19, 64  }
  0x3e   : > { %1176 = vsyncadd (%p1339_p13), %s336_s19, 4294967232  ;;  %v889_v0 = vld [vmem:[%s1399_s11 + $0x38] sm:$0xff]  ;;  %v888_v2 = vld [vmem:[%s1399_s11 + $0x30] sm:$0xff]  ;;  %v1209_v26 = vmov 8.0   ;;  %s611_s13 = sld [smem:[#allocation3]]  ;;  %s879_s14 = sshll.u32 %s1195_s26, 3 }
  0x3f   : > { %v897_v1 = vld [vmem:[%s1399_s11 + $0x78] sm:$0xff]  ;;  %523 = vmatpush.bf16.msra.mxu0 %v889_v0  ;;  %v896_v3 = vld [vmem:[%s1399_s11 + $0x70] sm:$0xff]  ;;  %v887_v4 = vld [vmem:[%s1399_s11 + $0x28] sm:$0xff]  ;;  %985 = vrcp.f32 %v1209_v26  ;;  %s654_s7 = scalar_lea.hbm %s1486_s6, %s879_s14  ;;  %s378_s10 = scalar_lea.vmem [#allocation12], %s809_s2 }
  0x40   : > { %536 = vmatpush.bf16.msra.mxu1 %v897_v1  ;;  %v895_v5 = vld [vmem:[%s1399_s11 + $0x68] sm:$0xff]  ;;  %v600_v6 = vld [vmem:[%s1484_s4] sm:$0x3]  ;;  %v885_v16 = vld [vmem:[%s1399_s11 + $0x18] sm:$0xff]  ;;  %s656_s8 = sshll.u32 %s378_s10, 4  ;;  %s658_s18 = sshll.u32 %s654_s7, 4  ;;  %s657_s8 = int_to_ptr.vmem [resolvable:$true] %s656_s8  ;;  %s659_s18 = int_to_ptr.hbm [resolvable:$true] %s658_s18 }
  0x41   : > { %v602_v7 = vperm.slane %v600_v6, 0  ;;  %v603_v8 = vperm.slane %v600_v6, 1  ;;  %v390_v9 = vld [vmem:[#allocation4] sm:$0xff]  ;;  %v391_v10 = vld [vmem:[#allocation4 + $0x8] sm:$0xff]  ;;  %v893_v17 = vld [vmem:[%s1399_s11 + $0x58] sm:$0xff]  ;;  %s644_s26 = scalar_lea.sflag [#allocation6], %s1386_s1 }
  0x42   : > { %v886_v13 = vld [vmem:[%s1399_s11 + $0x20] sm:$0xff]  ;;  %v884_v18 = vld [vmem:[%s1399_s11 + $0x10] sm:$0xff]  ;;  %v883_v20 = vld [vmem:[%s1399_s11 + $0x8] sm:$0xff]  ;;  %v393_v24 = vpack.c.bf16 %v390_v9, %v390_v9  ;;  %v394_v25 = vpack.c.bf16 %v391_v10, %v391_v10  ;;  %s1127_s20 = sshra.s32 %s659_s18, 4  ;;  %s1128_s20 = int_to_ptr.hbm [resolvable:$true] %s1127_s20 }
  0x43   : > { %524 = vmatpush.bf16.msra.mxu0 %v888_v2  ;;  %v606_v11 = vmul.f32 %v602_v7, %v390_v9  ;;  %v607_v12 = vmul.f32 %v603_v8, %v391_v10  ;;  %v894_v14 = vld [vmem:[%s1399_s11 + $0x60] sm:$0xff]  ;;  %v892_v19 = vld [vmem:[%s1399_s11 + $0x50] sm:$0xff]  ;;  %v891_v21 = vld [vmem:[%s1399_s11 + $0x48] sm:$0xff]  ;;  %s1129_s30 = scalar_lea.hbm %s1128_s20, 8  ;;  %p1134_p10 = scmp.lt.s32.totalorder %s1128_s20, %s1486_s6 }
  0x44   : > { %537 = vmatpush.bf16.msra.mxu1 %v896_v3  ;;  %v882_v22 = vld [vmem:[%s1399_s11] sm:$0xff]  ;;  %v612_v45 = vstv %s611_s13  ;;  %p1130_p7 = scmp.ne.s32.totalorder %s1128_s20, %s1129_s30 }
  0x45   : > { %v608_v15 = vadd.f32 %v607_v12, %v606_v11  ;;  %v890_v23 = vld [vmem:[%s1399_s11 + $0x40] sm:$0xff]  ;;  %v986_v27 = vpop.eup %985 }
  0x46   : > { %v1428_v28 = vld [vmem:[%s1402_s21] sm:$0x7]  ;;  %v565_v29 = vmul.f32 8.0, %v986_v27  ;;  %vm569_vm0 = vweird.f32 %v986_v27  ;;  %p1131_p8 = pnand %p1130_p7, %p1346_p0 }
  0x47   : > { %525 = vmatpush.bf16.msra.mxu0 %v887_v4  ;;  %609 = vadd.xlane.f32.xlu0 %v608_v15  ;;  %v556_v30 = vperm.slane %v1428_v28, 0 }
  0x48   : > { %538 = vmatpush.bf16.msra.mxu1 %v895_v5  ;;  %v566_v34 = vsub.f32 1.0, %v565_v29  ;;  %p1132_p9 = pneg %p1131_p8 }
  0x4a   : > { %v567_v37 = vmul.f32 %v986_v27, %v566_v34 }
  0x4b   : > { %526 = vmatpush.bf16.msra.mxu0 %v886_v13 }
  0x4c   : > { %539 = vmatpush.bf16.msra.mxu1 %v894_v14  ;;  %v568_v42 = vadd.f32 %v986_v27, %v567_v37 }
  0x4e   : > { %v570_v47 = vsel %vm569_vm0, %v986_v27, %v568_v42 }
  0x4f   : > { %527 = vmatpush.bf16.msra.mxu0 %v885_v16 }
  0x50   : > { %540 = vmatpush.bf16.msra.mxu1 %v893_v17 }
  0x53   : > { %528 = vmatpush.bf16.msra.mxu0 %v884_v18 }
  0x54   : > { %541 = vmatpush.bf16.msra.mxu1 %v892_v19 }
  0x57   : > { %529 = vmatpush.bf16.msra.mxu0 %v883_v20 }
  0x58   : > { %542 = vmatpush.bf16.msra.mxu1 %v891_v21 }
  0x5b   : > { %530 = vmatpush.bf16.msra.mxu0 %v882_v22  ;;  %v637_v22 = vld [vmem:[%s1391_s28] sm:$0xff]  ;;  %s1133_s28 = scalar_lea.hbm %s1486_s6, 16 }
  0x5c   : > { %543 = vmatpush.bf16.msra.mxu1 %v890_v23  ;;  %p1135_p11 = scmp.lt.s32.totalorder %s1133_s28, %s1129_s30 }
  0x5e   : > { %531 = vmatmul.bf16.vlgmr.msra.gmra.mxu0 %v393_v24  ;;  %p1136_p12 = por %p1135_p11, %p1134_p10 }
  0x5f   : > { %544 = vmatmul.bf16.vlgmr.msra.gmra.mxu1 %v394_v25 }
  0x60   : > { %p1137_p13 = pnand %p1136_p12, %p1132_p9 }
  0xba   : > { %v610_v44 = vpop.xlane.xlu0 %609 }
  0xbb   : > { %v613_v49 = vadd.f32 %v612_v45, %v610_v44 }
  0xbd   : > { %v877_v52 = vmul.f32 -1.442695, %v613_v49 }
  0xbf   : > { %987 = vpow2.f32 %v877_v52 }
  0xc5   : > { %v988_v57 = vpop.eup %987 }
  0xc6   : > { %v617_v60 = vadd.f32 1.0, %v988_v57 }
  0xc8   : > { %989 = vrcp.f32 %v617_v60  ;;  %vm623_vm4 = vweird.f32 %v617_v60  ;;  %v629_v11 = vand.u32 2147483648, %v617_v60  ;;  %v627_v14 = vand.u32 2147483647, %v617_v60 }
  0xca   : > { %v630_v16 = vor.u32 1.1754944e-38, %v629_v11  ;;  %vm628_vm7 = vcmp.eq.f32.partialorder %v627_v14, 8.507059e+37 }
  0xce   : > { %v990_v0 = vpop.eup %989 }
  0xcf   : > { %v619_v2 = vmul.f32 %v990_v0, %v617_v60  ;;  %vm624_vm5 = vweird.f32 %v990_v0 }
  0xd0   : > { %vm625_vm6 = vmor %vm623_vm4, %vm624_vm5 }
  0xd1   : > { %v620_v5 = vsub.f32 1.0, %v619_v2 }
  0xd3   : > { %v621_v8 = vmul.f32 %v990_v0, %v620_v5 }
  0xd5   : > { %v622_v13 = vadd.f32 %v990_v0, %v621_v8 }
  0xd7   : > { %v626_v19 = vsel %vm625_vm6, %v990_v0, %v622_v13 }
  0xd8   : > { %v631_v21 = vsel %vm628_vm7, %v630_v16, %v626_v19 }
  0xd9   : > { %v638_v26 = vmul.f32 %v637_v22, %v631_v21 }
  0xdb   : > { %v532_v31 = vpop.f32.mrf.mxu0 }
  0xdc   : > { %v545_v32 = vpop.f32.mrf.mxu1 }
  0xdd   : > { %v546_v33 = vadd.f32 %v545_v32, %v532_v31 }
  0xdf   : > { %v1431_v35 = vadd.f32 %v556_v30, %v546_v33 }
  0xe1   : > { %v558_v36 = vrot.slane %v1431_v35, 4 }
  0xe3   : > { %v559_v38 = vadd.f32 %v558_v36, %v1431_v35  ;;  %v534_v39 = vpop.f32.mrf.mxu0 }
  0xe4   : > { %v547_v40 = vpop.f32.mrf.mxu1 }
  0xe5   : > { %v560_v41 = vrot.slane %v559_v38, 2 }
  0xe7   : > { %v561_v43 = vadd.f32 %v560_v41, %v559_v38 }
  0xe9   : > { %v562_v46 = vrot.slane %v561_v43, 1 }
  0xeb   : > { %v563_v48 = vadd.f32 %v562_v46, %v561_v43 }
  0xed   : > { %v571_v50 = vmul.f32 %v570_v47, %v563_v48 }
  0xef   : > { %v572_v51 = vsub.f32 %v1431_v35, %v571_v50 }
  0xf1   : > { %v573_v53 = vmul.f32 %v572_v51, %v572_v51 }
  0xf3   : > { %v574_v54 = vrot.slane %v573_v53, 4 }
  0xf5   : > { %v575_v55 = vadd.f32 %v574_v54, %v573_v53 }
  0xf7   : > { %v576_v56 = vrot.slane %v575_v55, 2 }
  0xf9   : > { %v577_v58 = vadd.f32 %v576_v56, %v575_v55 }
  0xfb   : > { %v578_v59 = vrot.slane %v577_v58, 1 }
  0xfd   : > { %v579_v61 = vadd.f32 %v578_v59, %v577_v58 }
  0xff   : > { %v580_v62 = vmul.f32 %v579_v61, %v570_v47 }
 0x101   : > { %v581_v63 = vadd.f32 1e-05, %v580_v62 }
 0x103   : > { %991 = vrsqrt.f32 %v581_v63  ;;  %vm588_vm2 = vweird.f32 %v581_v63 }
 0x109   : > { %v992_v1 = vpop.eup %991 }
 0x10a   : > { %v583_v3 = vmul.f32 %v992_v1, %v581_v63  ;;  %vm589_vm1 = vweird.f32 %v992_v1 }
 0x10b   : > { %vm590_vm3 = vmor %vm588_vm2, %vm589_vm1 }
 0x10c   : > { %v584_v4 = vmul.f32 %v992_v1, %v583_v3 }
 0x10e   : > { %v585_v6 = vmul.f32 0.5, %v584_v4 }
 0x110   : > { %v586_v7 = vsub.f32 1.5, %v585_v6 }
 0x112   : > { %v587_v9 = vmul.f32 %v992_v1, %v586_v7 }
 0x114   : > { %v591_v10 = vsel %vm590_vm3, %v992_v1, %v587_v9 }
 0x115   : > { %v592_v12 = vmul.f32 %v591_v10, %v1428_v28 }
 0x117   : > { %v593_v15 = vmul.f32 %v592_v12, %v571_v50  ;;  %v633_v18 = vperm.slane %v592_v12, 1 }
 0x119   : > { %v595_v17 = vrot.slane %v593_v15, 7  ;;  %v634_v23 = vmul.f32 %v633_v18, %v1431_v35 }
 0x11b   : > { %v597_v20 = vsub.f32 %v1428_v28, %v595_v17 }
 0x11d   : > { %v635_v24 = vperm.slane %v597_v20, 2 }
 0x11f   : > { %v636_v25 = vadd.f32 %v635_v24, %v634_v23 }
 0x121   : > { %v639_v27 = vadd.f32 %v638_v26, %v636_v25 }
 0x123   : > { %v640_v28 = vmul.f32 0.2, %v639_v27 }
 0x125   : > { %v641_v29 = vmax.f32 %v639_v27, %v640_v28 }
 0x127   : > { %642 = vst [vmem:[%s378_s10] sm:$0xff] %v641_v29 }
 0x128   : > { %1140 = shalt.err (!%p1137_p13)
}
 0x129   : > { %908 = dma.vmem_to_hbm [thread:$0]  (%p1346_p0), %s657_s8, 128, %s659_s18, %s644_s26  }
 0x12a PF: > { %s1509_s1 = sld [smem:[#allocation18_spill]]  ;;  %s670_s9 = sand.u32 1, %s1183_s23  }
 0x12b   : > { %p925_p4 = pnand %p800_p3, %p1350_p2  ;;  %s671_s11 = scalar_lea.sflag [#allocation6], %s670_s9 }
 0x12d   : > { %p926_p5 = pneg %p925_p4 }
 0x12f   : > { %1178 = dma.done.wait (%p926_p5), %s671_s11, 128  }
 0x130   : > { %1180 = vsyncadd (%p926_p5), %s671_s11, 4294967168  ;;  %s27_s28 = sadd.s32 1, %s1509_s1   ;;  %s1510_s19 = sld [smem:[#allocation17_spill]] }
 0x131   : > { %p24_p1 = scmp.ge.s32.totalorder %s27_s28, 4   ;;  %s1511_s25 = sld [smem:[#allocation20_spill]] }
 0x132   : > { %s1512_s16 = sld [smem:[#allocation19_spill]]  ;;  %s1513_s23 = smov %s1187_s24 }
 0x133   : > { %s1515_s26 = smov %s1199_s27 }
 0x134   :  { %26 = sbr.rel (!%p24_p1) target bundleno = 14 (0xe), region = 127 }
 0x136   : > { %s1514_s24 = smov %s1510_s19 }
 0x138   : > { %s1516_s27 = smov %s1512_s16 }
 0x139   :  { %677 = vsyncpa [#allocation5], 1 }
 0x13a   :  { %679 = vsyncpa [#allocation5 + $0x1], 1 }
 0x13b   :  { %680 = vsyncpa [#allocation8], 1 }
 0x13c   :  { %682 = vsyncpa [#allocation8 + $0x1], 1 }
 0x13d   :  { %683 = vsyncpa [#allocation11], 1 }
 0x13e   :  { %685 = vsyncpa [#allocation11 + $0x1], 1 }
 0x13f   :  { %686 = vsyncpa [#allocation6], 1 }
 0x140   :  { %688 = vsyncpa [#allocation6 + $0x1], 1 }

</bundles_post_ra>
